<compile_context>
chip_gen: v5e
topology: v5e:2x2
jax: 0.10.0
libtpu: 0.0.40
codegen_flags: <defaults>
</compile_context>

<pallas_src>
import jax
import jax.numpy as jnp
from jax.experimental import pallas as pl
from jax.experimental.pallas import tpu as pltpu


def _round_up(x, m):
    return (x + m - 1) * m // m if False else ((x + m - 1) // m) * m


def _hypernet_kernel(x_ref, w1_ref, b1_ref, w2_ref, b2_ref, out_ref):
    # Hidden layer on the MXU: (TB, D) @ (D, 128), f32 accumulation.
    h = jnp.dot(x_ref[...], w1_ref[...], preferred_element_type=jnp.float32)
    # Bias + ReLU epilogue on the VPU (kept in f32 — no bf16 VPU on v5e).
    h = jnp.maximum(h + b1_ref[...], 0.0)
    # Output layer: (TB, 128) @ (128, N_pad). N_pad is a multiple of 128, so
    # the store below is a full-lane (unmasked) store.
    o = jnp.dot(h, w2_ref[...], preferred_element_type=jnp.float32)
    out_ref[...] = (o + b2_ref[...]).astype(out_ref.dtype)


def attention_hypernetwork_forward(task_embedding, w1, b1, w2, b2, *, block_b=256):
    """task_embedding: (B, task_embed_dim) f32 -> (B, out_dim, 1) f32."""
    B, D = task_embedding.shape
    hidden = w1.shape[1]
    out_dim = w2.shape[1]

    # --- Lane-dense output: pad out_dim -> multiple of 128 with zero columns.
    n_pad = _round_up(out_dim, 128)
    if n_pad != out_dim:
        w2 = jnp.pad(w2, ((0, 0), (0, n_pad - out_dim)))
        b2 = jnp.pad(b2, ((0, 0), (0, n_pad - out_dim)))

    # --- Batch tiling: pad B to a sublane-friendly tile and grid over it.
    tb = min(block_b, _round_up(B, 8))
    b_pad = _round_up(B, tb)
    if b_pad != B:
        task_embedding = jnp.pad(task_embedding, ((0, b_pad - B), (0, 0)))

    grid = (b_pad // tb,)

    flat = pl.pallas_call(
        _hypernet_kernel,
        out_shape=jax.ShapeDtypeStruct((b_pad, n_pad), jnp.float32),
        grid=grid,
        in_specs=[
            # Activations: tiled along the batch grid axis.
            pl.BlockSpec((tb, D), lambda i: (i, 0)),
            # Weights / biases: constant block index -> VMEM-resident across
            # all grid iterations (loaded once).
            pl.BlockSpec((D, hidden), lambda i: (0, 0)),
            pl.BlockSpec((1, hidden), lambda i: (0, 0)),
            pl.BlockSpec((hidden, n_pad), lambda i: (0, 0)),
            pl.BlockSpec((1, n_pad), lambda i: (0, 0)),
        ],
        out_specs=pl.BlockSpec((tb, n_pad), lambda i: (i, 0)),
        compiler_params=pltpu.CompilerParams(
            dimension_semantics=("parallel",),
        ),
    )(task_embedding, w1, b1, w2, b2)

    # Strip batch/lane padding; keep (B, out_dim) lane-friendly internally and
    # do the module's .view(-1, out_dim, 1) only at the host-facing boundary.
    return flat[:B, :out_dim].reshape(-1, out_dim, 1)


def init_params(key, task_embed_dim, out_dim, hidden=128):
    """Deterministic PyTorch-style Linear init: U(-1/sqrt(fan_in), 1/sqrt(fan_in))."""
    k1, k2, k3, k4 = jax.random.split(key, 4)
    lim1 = 1.0 / jnp.sqrt(task_embed_dim)
    lim2 = 1.0 / jnp.sqrt(hidden)
    w1 = jax.random.uniform(k1, (task_embed_dim, hidden), jnp.float32, -lim1, lim1)
    b1 = jax.random.uniform(k2, (1, hidden), jnp.float32, -lim1, lim1)
    w2 = jax.random.uniform(k3, (hidden, out_dim), jnp.float32, -lim2, lim2)
    b2 = jax.random.uniform(k4, (1, out_dim), jnp.float32, -lim2, lim2)
    return w1, b1, w2, b2


if __name__ == "__main__":
    # Small shapes consistent with the module's forward.
    B, TASK_EMBED_DIM, OUT_DIM = 2, 32, 64

    key = jax.random.PRNGKey(0)
    k_x, k_p = jax.random.split(key)
    task_embedding = jax.random.normal(k_x, (B, TASK_EMBED_DIM), jnp.float32)
    w1, b1, w2, b2 = init_params(k_p, TASK_EMBED_DIM, OUT_DIM)

    out = attention_hypernetwork_forward(task_embedding, w1, b1, w2, b2)
    out = jax.block_until_ready(out)

    # Reference check in plain JAX (same math as the PyTorch module).
    ref = jnp.maximum(task_embedding @ w1 + b1, 0.0) @ w2 + b2
    ref = ref.reshape(-1, OUT_DIM, 1)
    assert out.shape == (B, OUT_DIM, 1), out.shape
    assert jnp.allclose(out, ref, atol=1e-5, rtol=1e-5)

    print("KERNEL_OK")
</pallas_src>

<mosaic_0001>
module attributes {stable_mosaic.version = 11 : i64} {
  func.func @_hypernet_kernel(%arg0: i32, %arg1: memref<8x32xf32, #tpu.memory_space<vmem>>, %arg2: memref<32x128xf32, #tpu.memory_space<vmem>>, %arg3: memref<1x128xf32, #tpu.memory_space<vmem>>, %arg4: memref<128x128xf32, #tpu.memory_space<vmem>>, %arg5: memref<1x128xf32, #tpu.memory_space<vmem>>, %arg6: memref<8x128xf32, #tpu.memory_space<vmem>>) attributes {dimension_semantics = [#tpu.dimension_semantics<parallel>], iteration_bounds = array<i64: 1>, scalar_prefetch = 0 : i64, scratch_operands = 0 : i64, tpu.core_type = #tpu.core_type<tc>, window_params = [{transform_indices = @transform_0, window_bounds = array<i64: 8, 32>}, {pipeline_mode = #tpu.pipeline_mode<synchronous>, transform_indices = @transform_1, window_bounds = array<i64: 32, 128>}, {pipeline_mode = #tpu.pipeline_mode<synchronous>, transform_indices = @transform_2, window_bounds = array<i64: 1, 128>}, {pipeline_mode = #tpu.pipeline_mode<synchronous>, transform_indices = @transform_3, window_bounds = array<i64: 128, 128>}, {pipeline_mode = #tpu.pipeline_mode<synchronous>, transform_indices = @transform_4, window_bounds = array<i64: 1, 128>}, {transform_indices = @transform_5, window_bounds = array<i64: 8, 128>}]} {
    %c0 = arith.constant 0 : index
    %c0_0 = arith.constant 0 : index
    %0 = vector.load %arg1[%c0, %c0_0] : memref<8x32xf32, #tpu.memory_space<vmem>>, vector<8x32xf32>
    %c0_1 = arith.constant 0 : index
    %c0_2 = arith.constant 0 : index
    %1 = vector.load %arg2[%c0_1, %c0_2] : memref<32x128xf32, #tpu.memory_space<vmem>>, vector<32x128xf32>
    %cst = arith.constant dense<0.000000e+00> : vector<8x128xf32>
    %2 = tpu.matmul %0, %1, %cst {dimension_numbers = #tpu.dot_dimension_numbers<[1], [0], [0], [1], [0, 0, 1, 1], [], []>} : vector<8x32xf32>, vector<32x128xf32>, vector<8x128xf32> -> vector<8x128xf32>
    %c0_3 = arith.constant 0 : index
    %c0_4 = arith.constant 0 : index
    %3 = vector.load %arg3[%c0_3, %c0_4] : memref<1x128xf32, #tpu.memory_space<vmem>>, vector<1x128xf32>
    %4 = vector.broadcast %3 : vector<1x128xf32> to vector<8x128xf32>
    %5 = arith.addf %2, %4 : vector<8x128xf32>
    %cst_5 = arith.constant 0.000000e+00 : f32
    %6 = vector.broadcast %cst_5 : f32 to vector<8x128xf32>
    %7 = arith.maximumf %5, %6 : vector<8x128xf32>
    %c0_6 = arith.constant 0 : index
    %c0_7 = arith.constant 0 : index
    %8 = vector.load %arg4[%c0_6, %c0_7] : memref<128x128xf32, #tpu.memory_space<vmem>>, vector<128x128xf32>
    %cst_8 = arith.constant dense<0.000000e+00> : vector<8x128xf32>
    %9 = tpu.matmul %7, %8, %cst_8 {dimension_numbers = #tpu.dot_dimension_numbers<[1], [0], [0], [1], [0, 0, 1, 1], [], []>} : vector<8x128xf32>, vector<128x128xf32>, vector<8x128xf32> -> vector<8x128xf32>
    %c0_9 = arith.constant 0 : index
    %c0_10 = arith.constant 0 : index
    %10 = vector.load %arg5[%c0_9, %c0_10] : memref<1x128xf32, #tpu.memory_space<vmem>>, vector<1x128xf32>
    %11 = vector.broadcast %10 : vector<1x128xf32> to vector<8x128xf32>
    %12 = arith.addf %9, %11 : vector<8x128xf32>
    %c0_11 = arith.constant 0 : index
    %c0_12 = arith.constant 0 : index
    %13 = vector.load %arg6[%c0_11, %c0_12] : memref<8x128xf32, #tpu.memory_space<vmem>>, vector<8x128xf32>
    tpu.vector_store %arg6[%c0_11, %c0_12], %12 {strides = array<i32>} : memref<8x128xf32, #tpu.memory_space<vmem>>, vector<8x128xf32>,
    return
  }
  func.func @transform_0(%arg0: i32) -> (i32, i32) {
    %c0_i32 = arith.constant 0 : i32
    %c0_i32_0 = arith.constant 0 : i32
    return %arg0, %c0_i32 : i32, i32
  }
  func.func @transform_1(%arg0: i32) -> (i32, i32) {
    %c0_i32 = arith.constant 0 : i32
    %c0_i32_0 = arith.constant 0 : i32
    %c0_i32_1 = arith.constant 0 : i32
    return %c0_i32, %c0_i32_0 : i32, i32
  }
  func.func @transform_2(%arg0: i32) -> (i32, i32) {
    %c0_i32 = arith.constant 0 : i32
    %c0_i32_0 = arith.constant 0 : i32
    %c0_i32_1 = arith.constant 0 : i32
    return %c0_i32, %c0_i32_0 : i32, i32
  }
  func.func @transform_3(%arg0: i32) -> (i32, i32) {
    %c0_i32 = arith.constant 0 : i32
    %c0_i32_0 = arith.constant 0 : i32
    %c0_i32_1 = arith.constant 0 : i32
    return %c0_i32, %c0_i32_0 : i32, i32
  }
  func.func @transform_4(%arg0: i32) -> (i32, i32) {
    %c0_i32 = arith.constant 0 : i32
    %c0_i32_0 = arith.constant 0 : i32
    %c0_i32_1 = arith.constant 0 : i32
    return %c0_i32, %c0_i32_0 : i32, i32
  }
  func.func @transform_5(%arg0: i32) -> (i32, i32) {
    %c0_i32 = arith.constant 0 : i32
    %c0_i32_0 = arith.constant 0 : i32
    return %arg0, %c0_i32 : i32, i32
  }
}

</mosaic_0001>

<bundles_post_ra>
// kernel: tpu_custom_call.1
= control target key start
LH: loop header
LB: loop body
LE: loop exit
PB: predicated region body
PF: predicated region fallthrough
CT: control target
= control target key end

     0   :  { %10 = vsyncpa [#allocation3], 0  ;;  %s324_s0 = inlined_call_operand.hbm [shape: f32[8,32], index: 0, kind: input, shape index: {}]   ;;  %s325_s1 = inlined_call_operand.hbm [shape: f32[32,128], index: 1, kind: input, shape index: {}]   ;;  %s326_s2 = inlined_call_operand.vmem [shape: f32[1,128], index: 2, kind: input, shape index: {}]   ;;  %s327_s3 = inlined_call_operand.hbm [shape: f32[128,128], index: 3, kind: input, shape index: {}]   ;;  %s328_s4 = inlined_call_operand.vmem [shape: f32[1,128], index: 4, kind: input, shape index: {}]   ;;  %s329_s5 = inlined_call_operand.hbm [shape: f32[8,128], index: 5, kind: output, shape index: {}]  }
   0x1   :  { %11 = vsyncpa [#allocation6], 0  ;;  %s28_s20 = sshll.u32 %s325_s1, 4  ;;  %s29_s20 = int_to_ptr.hbm [resolvable:$true] %s28_s20 }
   0x2   :  { %12 = vsyncpa [#allocation4], 0  ;;  %s270_s21 = smov [#allocation5]   ;;  %s18_s25 = sshll.u32 %s324_s0, 4  ;;  %s19_s25 = int_to_ptr.hbm [resolvable:$true] %s18_s25 }
   0x3   :  { %s30_s22 = sshll.u32 %s270_s21, 4  ;;  %s271_s26 = smov 128   ;;  %s31_s22 = int_to_ptr.vmem [resolvable:$true] %s30_s22 }
   0x4   :  { %s272_s27 = smov 8   ;;  %s273_s28 = smov [#allocation2]  }
   0x5   :  { %36 = dma.hbm_to_vmem [thread:$0]  %s29_s20, 512, %s31_s22, [#allocation6], %s271_s26, %s271_s26, %s272_s27  }
   0x6   :  { %s20_s29 = sshll.u32 %s273_s28, 4  ;;  %s43_s7 = sshll.u32 %s327_s3, 4  ;;  %s21_s29 = int_to_ptr.vmem [resolvable:$true] %s20_s29  ;;  %s44_s7 = int_to_ptr.hbm [resolvable:$true] %s43_s7 }
   0x7   :  { %23 = dma.hbm_to_vmem [thread:$0]  %s19_s25, 128, %s21_s29, [#allocation3]  }
   0x8   :  { %s274_s1 = smov [#allocation7]  }
   0x9   :  { %s45_s8 = sshll.u32 %s274_s1, 4  ;;  %s46_s8 = int_to_ptr.vmem [resolvable:$true] %s45_s8 }
   0xa   :  { %51 = dma.hbm_to_vmem [thread:$0]  %s44_s7, 2048, %s46_s8, [#allocation6], %s271_s26, %s271_s26, %s272_s27  }
   0xb   :  { %264 = dma.done.wait [#allocation3], 128  }
   0xc   :  { %265 = vsyncadd [#allocation3], 4294967168 }
   0xd   :  { %266 = dma.done.wait [#allocation6], 2560  }
   0xe   :  { %267 = vsyncadd [#allocation6], 4294964736  ;;  %v70_v0 = vld [vmem:[#allocation5 + $0x18] sm:$0xff]  ;;  %v69_v1 = vld [vmem:[#allocation5 + $0x10] sm:$0xff]  ;;  %vm75_vm0 = vcmask 261120   ;;  %s275_s11 = smov [#allocation8]  }
   0xf   :  { %91 = vmatpush.msra.mxu0 %v70_v0  ;;  %v115_v2 = vld [vmem:[#allocation7 + $0x78] sm:$0xff]  ;;  %v68_v3 = vld [vmem:[#allocation5 + $0x8] sm:$0xff]  ;;  %v114_v4 = vld [vmem:[#allocation7 + $0x70] sm:$0xff]  ;;  %s146_s12 = sshll.u32 %s275_s11, 4  ;;  %s148_s15 = sshll.u32 %s329_s5, 4  ;;  %s147_s12 = int_to_ptr.vmem [resolvable:$true] %s146_s12  ;;  %s149_s15 = int_to_ptr.hbm [resolvable:$true] %s148_s15 }
  0x10   :  { %120 = vmatpush.msra.mxu1 %v115_v2  ;;  %v113_v5 = vld [vmem:[#allocation7 + $0x68] sm:$0xff]  ;;  %v67_v6 = vld [vmem:[#allocation5] sm:$0xff]  ;;  %v66_v7 = vld [vmem:[#allocation2] sm:$0xff] }
  0x11   :  { %92 = vmatpush.msra.mxu0 %v69_v1  ;;  %v112_v8 = vld [vmem:[#allocation7 + $0x60] sm:$0xff]  ;;  %v111_v9 = vld [vmem:[#allocation7 + $0x58] sm:$0xff]  ;;  %v110_v10 = vld [vmem:[#allocation7 + $0x50] sm:$0xff] }
  0x12   :  { %121 = vmatpush.msra.mxu1 %v114_v4  ;;  %v109_v11 = vld [vmem:[#allocation7 + $0x48] sm:$0xff]  ;;  %v108_v12 = vld [vmem:[#allocation7 + $0x40] sm:$0xff]  ;;  %v107_v13 = vld [vmem:[#allocation7 + $0x38] sm:$0xff] }
  0x13   :  { %93 = vmatpush.msra.mxu0 %v68_v3  ;;  %v106_v14 = vld [vmem:[#allocation7 + $0x30] sm:$0xff]  ;;  %v105_v15 = vld [vmem:[#allocation7 + $0x28] sm:$0xff]  ;;  %v104_v16 = vld [vmem:[#allocation7 + $0x20] sm:$0xff] }
  0x14   :  { %122 = vmatpush.msra.mxu1 %v113_v5  ;;  %v103_v17 = vld [vmem:[#allocation7 + $0x18] sm:$0xff]  ;;  %v102_v18 = vld [vmem:[#allocation7 + $0x10] sm:$0xff]  ;;  %v101_v19 = vld [vmem:[#allocation7 + $0x8] sm:$0xff] }
  0x15   :  { %94 = vmatpush.msra.mxu0 %v67_v6  ;;  %v100_v20 = vld [vmem:[#allocation7] sm:$0xff]  ;;  %v166_v21 = vld [vmem:[%s326_s2] ss:$0 sm:$0xff] }
  0x16   :  { %159 = vmatmul.msk.f32.vlgmr.msra.gmra.mxu0 %vm75_vm0, %v66_v7  ;;  %123 = vmatpush.msra.mxu1 %v112_v8  ;;  %v167_v25 = vld [vmem:[%s328_s4] ss:$0 sm:$0xff] }
  0x18   :  { %124 = vmatpush.msra.mxu1 %v111_v9 }
  0x1a   :  { %125 = vmatpush.msra.mxu1 %v110_v10 }
  0x1c   :  { %126 = vmatpush.msra.mxu1 %v109_v11 }
  0x1e   :  { %127 = vmatpush.msra.mxu1 %v108_v12 }
  0x20   :  { %128 = vmatpush.msra.mxu1 %v107_v13 }
  0x22   :  { %129 = vmatpush.msra.mxu1 %v106_v14 }
  0x24   :  { %130 = vmatpush.msra.mxu1 %v105_v15 }
  0x26   :  { %131 = vmatpush.msra.mxu1 %v104_v16 }
  0x28   :  { %132 = vmatpush.msra.mxu1 %v103_v17 }
  0x2a   :  { %133 = vmatpush.msra.mxu1 %v102_v18 }
  0x2c   :  { %134 = vmatpush.msra.mxu1 %v101_v19 }
  0x2e   :  { %135 = vmatpush.msra.mxu1 %v100_v20 }
  0x93   :  { %v96_v22 = vpop.f32.mrf.mxu0 }
  0x94   :  { %v97_v23 = vadd.f32 %v166_v21, %v96_v22 }
  0x96   :  { %v99_v24 = vmax.f32 %v97_v23, 0.0 }
  0x98   :  { %136 = vmatmul.f32.vlgmr.msra.gmra.mxu1 %v99_v24 }
 0x115   :  { %v137_v26 = vpop.f32.mrf.mxu1 }
 0x116   :  { %v138_v27 = vadd.f32 %v167_v25, %v137_v26 }
 0x118   :  { %140 = vst [vmem:[#allocation8] sm:$0xff] %v138_v27 }
 0x119   :  { %151 = dma.vmem_to_hbm [thread:$0]  %s147_s12, 128, %s149_s15, [#allocation4]  }
 0x11a   :  { %268 = dma.done.wait [#allocation4], 128  }
 0x11b   :  { %269 = vsyncadd [#allocation4], 4294967168 }
 0x11c   :  { %156 = vsyncpa [#allocation3], 1 }
 0x11d   :  { %157 = vsyncpa [#allocation6], 1 }
 0x11e   :  { %158 = vsyncpa [#allocation4], 1 }

</bundles_post_ra>
